<compile_context>
chip_gen: v6e
topology: v6e:2x2x1
jax: 0.10.0
libtpu: 0.0.40
codegen_flags: <defaults>
</compile_context>

<pallas_src>
import functools
import math

import jax
import jax.numpy as jnp
import numpy as np
from jax.experimental import pallas as pl
from jax.experimental.pallas import tpu as pltpu


def _round_up(x, m):
    return ((x + m - 1) // m) * m


def _choose_tile(total, cap):
    """Lane-dense tile: multiple of 128, <= cap, and aiming for >= 2 chunks
    (v7x shards 'parallel' grid axes across its 2 TensorCores)."""
    padded = _round_up(total, 128)
    if padded <= 128:
        return 128
    return max(128, min(cap, _round_up(padded // 2, 128)))


def _temb_kernel(idx_ref, table_ref, out_ref, *, k_tile):
    # idx_ref:   (1, LT)          int32   clamped indices for this lane chunk
    # table_ref: (F, time_pad)    float32 full pre-transposed embedding table
    # out_ref:   (F, LT) or (1, F, LT)    lane-dense output chunk
    f, time_pad = table_ref.shape
    lt = idx_ref.shape[-1]
    idx = idx_ref[...]                                              # (1, LT)
    num_k = time_pad // k_tile

    def one_block(k0):
        tab = table_ref[:, pl.ds(k0, k_tile)]                       # (F, k_tile)
        iota = jax.lax.broadcasted_iota(jnp.int32, (k_tile, lt), 0) + k0
        onehot = (iota == idx).astype(jnp.float32)                  # (k_tile, LT)
        # (F, k_tile) @ (k_tile, LT) -> (F, LT); one nonzero per output column,
        # so one-hot selection is exact in f32.
        return jax.lax.dot_general(
            tab, onehot,
            dimension_numbers=(((1,), (0,)), ((), ())),
            preferred_element_type=jnp.float32)

    if num_k == 1:
        acc = one_block(0)
    else:
        def body(k, acc):
            k0 = pl.multiple_of(k * k_tile, k_tile)
            return acc + one_block(k0)
        acc = jax.lax.fori_loop(0, num_k, body,
                                jnp.zeros((f, lt), jnp.float32))

    out_ref[...] = acc.reshape(out_ref.shape).astype(out_ref.dtype)


def temporal_embedding(x, time_day_table, time, *,
                       force_pallas=False, k_tile=256, lane_cap=8192):
    """x: (B, T, N, C) float; time_day_table: (time, F) float32 -> (B, F, N, 1)."""
    B, T, N, C = x.shape
    time_dim, F = time_day_table.shape
    assert time_dim == time

    # --- JAX glue: integer indices. Truncation toward zero matches torch
    # .long() on the [0, 1) domain; the clamp guards day == 1.0 / out-of-domain
    # values (torch's gather would error there instead).
    day = x[:, -1, :, 1].astype(jnp.float32)                             # (B, N)
    idx = jnp.clip((day * float(time)).astype(jnp.int32), 0, time - 1)   # (B, N)
    BN = B * N

    # Size gate: for tiny problems a fused XLA gather beats the custom call.
    if not force_pallas and BN * F < (1 << 16):
        emb = jnp.take(time_day_table, idx, axis=0)                      # (B, N, F)
        return jnp.transpose(emb, (0, 2, 1))[..., None]

    # Pre-transpose the table to (F, time) once (in-kernel dot becomes plain
    # A @ B); pad the time axis so every K block is full-width.
    if time <= k_tile:
        kt, time_pad = time, time
    else:
        kt = k_tile
        time_pad = _round_up(time, k_tile)
    table_t = jnp.transpose(time_day_table).astype(jnp.float32)          # (F, time)
    if time_pad != time:
        # Padded columns are never selected (idx < time) and are zero anyway.
        table_t = jnp.pad(table_t, ((0, 0), (0, time_pad - time)))

    kernel = functools.partial(_temb_kernel, k_tile=kt)

    if N >= 128:
        # Direct consumer layout: (B, F, N_pad), grid over (B, N-chunks).
        n_tile = (min(_round_up(N, 128), lane_cap) if B >= 2
                  else _choose_tile(N, lane_cap))
        N_pad = _round_up(N, n_tile)
        num_n = N_pad // n_tile
        # Padded lanes gather row 0; they live in out[..., N:N_pad] and are
        # sliced off below.
        idx_pad = jnp.pad(idx, ((0, 0), (0, N_pad - N)))                 # (B, N_pad)
        idx_flat = idx_pad.reshape(1, B * N_pad)
        out = pl.pallas_call(
            kernel,
            out_shape=jax.ShapeDtypeStruct((B, F, N_pad), jnp.float32),
            grid_spec=pltpu.PrefetchScalarGridSpec(
                num_scalar_prefetch=0,
                grid=(B, num_n),
                in_specs=[
                    pl.BlockSpec((1, n_tile), lambda b, j: (0, b * num_n + j)),
                    pl.BlockSpec((F, time_pad), lambda b, j: (0, 0)),
                ],
                out_specs=pl.BlockSpec((1, F, n_tile), lambda b, j: (b, 0, j)),
            ),
            compiler_params=pltpu.CompilerParams(
                dimension_semantics=("parallel", "parallel")),
            cost_estimate=pl.CostEstimate(
                flops=2 * time_pad * F * B * N_pad,
                transcendentals=0,
                bytes_accessed=4 * (B * N_pad + F * time_pad + B * F * N_pad)),
        )(idx_flat, table_t)                                             # (B, F, N_pad)
        emb = out if N_pad == N else out[:, :, :N]
        return emb[..., None]                                            # (B, F, N, 1)

    # Fallback (small N): flatten (B, N) into the lane axis; transpose at end.
    lane_tile = _choose_tile(BN, lane_cap)
    L = _round_up(BN, lane_tile)
    num_chunks = L // lane_tile
    idx_flat = jnp.pad(idx.reshape(1, BN), ((0, 0), (0, L - BN)))        # (1, L)
    out_flat = pl.pallas_call(
        kernel,
        out_shape=jax.ShapeDtypeStruct((F, L), jnp.float32),
        grid_spec=pltpu.PrefetchScalarGridSpec(
            num_scalar_prefetch=0,
            grid=(num_chunks,),
            in_specs=[
                pl.BlockSpec((1, lane_tile), lambda c: (0, c)),
                pl.BlockSpec((F, time_pad), lambda c: (0, 0)),
            ],
            out_specs=pl.BlockSpec((F, lane_tile), lambda c: (0, c)),
        ),
        compiler_params=pltpu.CompilerParams(
            dimension_semantics=("parallel",)),
        cost_estimate=pl.CostEstimate(
            flops=2 * time_pad * F * L,
            transcendentals=0,
            bytes_accessed=4 * (L + F * time_pad + F * L)),
    )(idx_flat, table_t)                                                 # (F, L)

    emb = out_flat[:, :BN].reshape(F, B, N)                              # (F, B, N)
    return jnp.transpose(emb, (1, 0, 2))[..., None]                      # (B, F, N, 1)


def _reference(x, table, time):
    idx = (x[:, -1, :, 1] * time).astype(jnp.int32)                      # (B, N)
    emb = jnp.take(table, idx, axis=0)                                   # (B, N, F)
    return jnp.transpose(emb, (0, 2, 1))[..., None]                      # (B, F, N, 1)


def _make_inputs(key, B, T, N, C, time, features):
    k_x, k_w = jax.random.split(key)
    x = jax.random.uniform(k_x, (B, T, N, C), dtype=jnp.float32,
                           minval=0.0, maxval=1.0)
    bound = math.sqrt(6.0 / (time + features))   # deterministic xavier_uniform
    table = jax.random.uniform(k_w, (time, features), dtype=jnp.float32,
                               minval=-bound, maxval=bound)
    return x, table


if __name__ == "__main__":
    key = jax.random.PRNGKey(0)
    k1, k2 = jax.random.split(key)

    # Test 1: small demo shapes -> exercises the flattened fallback kernel
    # (single 128-lane chunk, single K block).
    B, T, N, C = 2, 8, 16, 2
    TIME, FEATURES = 48, 32
    x, table = _make_inputs(k1, B, T, N, C, TIME, FEATURES)
    out = jax.block_until_ready(
        temporal_embedding(x, table, TIME, force_pallas=True))
    ref = jax.block_until_ready(_reference(x, table, TIME))
    assert out.shape == (B, FEATURES, N, 1), out.shape
    np.testing.assert_allclose(np.asarray(out), np.asarray(ref),
                               rtol=1e-6, atol=1e-6)

    # Test 2: N >= 128 and time > k_tile -> exercises the direct (B, F, N)
    # output layout (no wrapper transpose) and the K-tiled fori_loop path.
    B2, T2, N2, C2 = 2, 8, 256, 2
    TIME2, FEATURES2 = 288, 32
    x2, table2 = _make_inputs(k2, B2, T2, N2, C2, TIME2, FEATURES2)
    out2 = jax.block_until_ready(
        temporal_embedding(x2, table2, TIME2, force_pallas=True))
    ref2 = jax.block_until_ready(_reference(x2, table2, TIME2))
    assert out2.shape == (B2, FEATURES2, N2, 1), out2.shape
    np.testing.assert_allclose(np.asarray(out2), np.asarray(ref2),
                               rtol=1e-6, atol=1e-6)

    print("KERNEL_OK")
</pallas_src>

<mosaic_0001>
module attributes {stable_mosaic.version = 11 : i64} {
  func.func @_temb_kernel(%arg0: i32, %arg1: memref<1x128xi32, #tpu.memory_space<vmem>>, %arg2: memref<32x48xf32, #tpu.memory_space<vmem>>, %arg3: memref<32x128xf32, #tpu.memory_space<vmem>>) attributes {dimension_semantics = [#tpu.dimension_semantics<parallel>], iteration_bounds = array<i64: 1>, scalar_prefetch = 0 : i64, scratch_operands = 0 : i64, tpu.core_type = #tpu.core_type<tc>, window_params = [{transform_indices = @transform_0, window_bounds = array<i64: 1, 128>}, {pipeline_mode = #tpu.pipeline_mode<synchronous>, transform_indices = @transform_1, window_bounds = array<i64: 32, 48>}, {transform_indices = @transform_2, window_bounds = array<i64: 32, 128>}]} {
    %c0 = arith.constant 0 : index
    %c0_0 = arith.constant 0 : index
    %0 = vector.load %arg1[%c0, %c0_0] : memref<1x128xi32, #tpu.memory_space<vmem>>, vector<1x128xi32>
    %c0_1 = arith.constant 0 : index
    %c0_2 = arith.constant 0 : index
    %1 = vector.load %arg2[%c0_1, %c0_2] : memref<32x48xf32, #tpu.memory_space<vmem>>, vector<32x48xf32>
    %2 = tpu.iota {dimensions = array<i32: 0>} : vector<48x128xi32>
    %c0_i32 = arith.constant 0 : i32
    %3 = vector.broadcast %c0_i32 : i32 to vector<48x128xi32>
    %4 = arith.addi %2, %3 : vector<48x128xi32>
    %5 = vector.broadcast %0 : vector<1x128xi32> to vector<48x128xi32>
    %6 = arith.cmpi eq, %4, %5 : vector<48x128xi32>
    %7 = arith.extui %6 : vector<48x128xi1> to vector<48x128xi32>
    %8 = arith.sitofp %7 : vector<48x128xi32> to vector<48x128xf32>
    %cst = arith.constant dense<0.000000e+00> : vector<32x128xf32>
    %9 = tpu.matmul %1, %8, %cst {dimension_numbers = #tpu.dot_dimension_numbers<[1], [0], [0], [1], [0, 0, 1, 1], [], []>} : vector<32x48xf32>, vector<48x128xf32>, vector<32x128xf32> -> vector<32x128xf32>
    %c0_3 = arith.constant 0 : index
    %c0_4 = arith.constant 0 : index
    %10 = vector.load %arg3[%c0_3, %c0_4] : memref<32x128xf32, #tpu.memory_space<vmem>>, vector<32x128xf32>
    tpu.vector_store %arg3[%c0_3, %c0_4], %9 {strides = array<i32>} : memref<32x128xf32, #tpu.memory_space<vmem>>, vector<32x128xf32>,
    return
  }
  func.func @transform_0(%arg0: i32) -> (i32, i32) {
    %c0_i32 = arith.constant 0 : i32
    %c0_i32_0 = arith.constant 0 : i32
    return %c0_i32, %arg0 : i32, i32
  }
  func.func @transform_1(%arg0: i32) -> (i32, i32) {
    %c0_i32 = arith.constant 0 : i32
    %c0_i32_0 = arith.constant 0 : i32
    %c0_i32_1 = arith.constant 0 : i32
    return %c0_i32, %c0_i32_0 : i32, i32
  }
  func.func @transform_2(%arg0: i32) -> (i32, i32) {
    %c0_i32 = arith.constant 0 : i32
    %c0_i32_0 = arith.constant 0 : i32
    return %c0_i32, %arg0 : i32, i32
  }
}

</mosaic_0001>

<bundles_post_ra>
// kernel: tpu_custom_call.1
= control target key start
LH: loop header
LB: loop body
LE: loop exit
PB: predicated region body
PF: predicated region fallthrough
CT: control target
= control target key end

     0   :  { %7 = vsyncpa [#allocation3], 0  ;;  %s361_s0 = inlined_call_operand.hbm [shape: s32[1,128], index: 0, kind: input, shape index: {}]   ;;  %s362_s1 = inlined_call_operand.hbm [shape: f32[32,48], index: 1, kind: input, shape index: {}]   ;;  %s363_s2 = inlined_call_operand.hbm [shape: f32[32,128], index: 2, kind: output, shape index: {}]  }
   0x1   :  { %8 = vsyncpa [#allocation6], 0 }
   0x2   :  { %9 = vsyncpa [#allocation4], 0  ;;  %s321_s9 = smov [#allocation2]   ;;  %s322_s11 = smov [#allocation5]  }
   0x3   :  { %s16_s10 = sshll.u32 %s321_s9, 4  ;;  %s25_s12 = sshll.u32 %s322_s11, 4  ;;  %s17_s10 = int_to_ptr.vmem [resolvable:$true] %s16_s10  ;;  %s26_s12 = int_to_ptr.vmem [resolvable:$true] %s25_s12 }
   0x4   :  { %s263_s13 = scalar_lea.vmem %s17_s10, 16  ;;  %s267_s14 = scalar_lea.vmem %s17_s10, 32 }
   0x5   :  { %p264_p0 = scmp.ne.s32.totalorder %s17_s10, %s263_s13  ;;  %p268_p1 = scmp.lt.s32.totalorder %s17_s10, %s17_s10 }
   0x6   :  { %p269_p2 = scmp.lt.s32.totalorder %s267_s14, %s263_s13 }
   0x8   :  { %p270_p3 = por %p269_p2, %p268_p1 }
   0xa   :  { %p271_p4 = pnand %p270_p3, %p264_p0 }
   0xc   :  { %274 = shalt.err (!%p271_p4)
}
   0xd   :  { %19 = dma.hbm_to_vmem [thread:$0]  %s361_s0, 16, %s17_s10, [#allocation3]  }
   0xe   :  { %s283_s17 = scalar_lea.vmem %s26_s12, 512  ;;  %p288_p6 = scmp.lt.s32.totalorder %s26_s12, %s26_s12 }
   0xf   :  { %p284_p5 = scmp.ne.s32.totalorder %s26_s12, %s283_s17  ;;  %p289_p7 = scmp.lt.s32.totalorder %s283_s17, %s283_s17 }
  0x11   :  { %p290_p8 = por %p289_p7, %p288_p6 }
  0x13   :  { %p291_p9 = pnand %p290_p8, %p284_p5 }
  0x15   :  { %294 = shalt.err (!%p291_p9)
}
  0x16   :  { %s323_s18 = smov 128   ;;  %s324_s19 = smov 8  }
  0x17   :  { %31 = dma.hbm_to_vmem [thread:$0]  %s362_s1, 512, %s26_s12, [#allocation6], %s323_s18, %s323_s18, %s324_s19  }
  0x18   :  { %315 = dma.done.wait [#allocation3], 16  }
  0x19   :  { %316 = vsyncadd [#allocation3], 4294967280 }
  0x1a   :  { %317 = dma.done.wait [#allocation6], 512  }
  0x1b   :  { %318 = vsyncadd [#allocation6], 4294966784  ;;  %v43_v0 = vlaneseq  ;;  %vm72_vm0 = vcmask 392192   ;;  %v192_v5 = vld [vmem:[#allocation2] ss:$0 sm:$0xff]  ;;  %v39_v6 = vld [vmem:[#allocation5] sm:$0xff] }
  0x1c   :  { %231 = vmatprep.mubr.msk.f32.mxu0 %vm72_vm0, %v39_v6  ;;  %v325_v8 = vmov 1.0   ;;  %v41_v10 = vld [vmem:[#allocation5 + $0x10] sm:$0xff]  ;;  %v40_v11 = vld [vmem:[#allocation5 + $0x8] sm:$0xff]  ;;  %v42_v12 = vld [vmem:[#allocation5 + $0x18] sm:$0xff]  ;;  %s326_s0 = smov [#allocation7]  }
  0x1d   :  { %v44_v1 = vshrl.u32 %v43_v0, 7  ;;  %234 = vmatprep.mubr.msk.f32.mxu1 %vm72_vm0, %v41_v10  ;;  %s179_s1 = sshll.u32 %s326_s0, 4  ;;  %s180_s1 = int_to_ptr.vmem [resolvable:$true] %s179_s1 }
  0x1e   :  { %s295_s22 = scalar_lea.vmem %s180_s1, 512  ;;  %p300_p11 = scmp.lt.s32.totalorder %s180_s1, %s180_s1 }
  0x1f   :  { %v49_v2 = vadd.s32 40, %v44_v1  ;;  %v48_v3 = vadd.s32 32, %v44_v1  ;;  %v47_v4 = vadd.s32 24, %v44_v1  ;;  %v46_v7 = vadd.s32 16, %v44_v1  ;;  %p296_p10 = scmp.ne.s32.totalorder %s180_s1, %s295_s22  ;;  %p301_p12 = scmp.lt.s32.totalorder %s295_s22, %s295_s22 }
  0x20   :  { %v45_v9 = vadd.s32 8, %v44_v1  ;;  %vm54_vm6 = vcmp.eq.s32.totalorder %v44_v1, %v192_v5 }
  0x21   :  { %vm59_vm1 = vcmp.eq.s32.totalorder %v49_v2, %v192_v5  ;;  %vm58_vm2 = vcmp.eq.s32.totalorder %v48_v3, %v192_v5  ;;  %vm57_vm3 = vcmp.eq.s32.totalorder %v47_v4, %v192_v5  ;;  %vm56_vm4 = vcmp.eq.s32.totalorder %v46_v7, %v192_v5  ;;  %p302_p13 = por %p301_p12, %p300_p11 }
  0x22   :  { %219 = vmatprep.subr.msk.mxu0 %vm59_vm1, %v325_v8  ;;  %237 = vmatprep.subr.msk.mxu1 %vm59_vm1, %v325_v8  ;;  %vm55_vm5 = vcmp.eq.s32.totalorder %v45_v9, %v192_v5 }
  0x23   :  { %220 = vmatpush3.msk.msra.mxu0 %vm59_vm1, %v325_v8  ;;  %243 = vmatpush3.msk.msra.mxu1 %vm59_vm1, %v325_v8  ;;  %p303_p0 = pnand %p302_p13, %p296_p10 }
  0x24   :  { %221 = vmatprep.subr.msk.mxu0 %vm58_vm2, %v325_v8  ;;  %238 = vmatprep.subr.msk.mxu1 %vm58_vm2, %v325_v8 }
  0x25   :  { %222 = vmatpush3.msk.msra.mxu0 %vm58_vm2, %v325_v8  ;;  %244 = vmatpush3.msk.msra.mxu1 %vm58_vm2, %v325_v8 }
  0x26   :  { %223 = vmatprep.subr.msk.mxu0 %vm57_vm3, %v325_v8  ;;  %239 = vmatprep.subr.msk.mxu1 %vm57_vm3, %v325_v8 }
  0x27   :  { %224 = vmatpush3.msk.msra.mxu0 %vm57_vm3, %v325_v8  ;;  %245 = vmatpush3.msk.msra.mxu1 %vm57_vm3, %v325_v8 }
  0x28   :  { %225 = vmatprep.subr.msk.mxu0 %vm56_vm4, %v325_v8  ;;  %240 = vmatprep.subr.msk.mxu1 %vm56_vm4, %v325_v8 }
  0x29   :  { %226 = vmatpush3.msk.msra.mxu0 %vm56_vm4, %v325_v8  ;;  %246 = vmatpush3.msk.msra.mxu1 %vm56_vm4, %v325_v8 }
  0x2a   :  { %227 = vmatprep.subr.msk.mxu0 %vm55_vm5, %v325_v8  ;;  %241 = vmatprep.subr.msk.mxu1 %vm55_vm5, %v325_v8 }
  0x2b   :  { %228 = vmatpush3.msk.msra.mxu0 %vm55_vm5, %v325_v8  ;;  %247 = vmatpush3.msk.msra.mxu1 %vm55_vm5, %v325_v8 }
  0x2c   :  { %229 = vmatprep.subr.msk.mxu0 %vm54_vm6, %v325_v8  ;;  %242 = vmatprep.subr.msk.mxu1 %vm54_vm6, %v325_v8 }
  0x2d   :  { %230 = vmatpush3.msk.msra.mxu0 %vm54_vm6, %v325_v8  ;;  %248 = vmatpush3.msk.msra.mxu1 %vm54_vm6, %v325_v8 }
  0x2e   :  { %232 = vmatmul.mubr.msk.f32.vlgmr.msra.gmra.mxu0 %vm72_vm0, %v40_v11  ;;  %235 = vmatmul.mubr.msk.f32.vlgmr.msra.gmra.mxu1 %vm72_vm0, %v42_v12 }
  0xee   :  { %v233_v13 = vpop.f32.mrf.mxu0  ;;  %v236_v14 = vpop.f32.mrf.mxu1 }
  0xef   :  { %171 = vst [vmem:[#allocation7 + $0x8] sm:$0xff] %v233_v13  ;;  %173 = vst [vmem:[#allocation7 + $0x18] sm:$0xff] %v236_v14 }
  0xf0   :  { %v151_v15 = vpop.f32.mrf.mxu0  ;;  %v161_v16 = vpop.f32.mrf.mxu1 }
  0xf1   :  { %170 = vst [vmem:[#allocation7] sm:$0xff] %v151_v15  ;;  %172 = vst [vmem:[#allocation7 + $0x10] sm:$0xff] %v161_v16 }
  0xf2   :  { %306 = shalt.err (!%p303_p0)
}
  0xf3   :  { %185 = dma.vmem_to_hbm [thread:$0]  %s180_s1, 512, %s363_s2, [#allocation4], %s323_s18, %s323_s18, %s324_s19  }
  0xf4   :  { %319 = dma.done.wait [#allocation4], 512  }
  0xf5   :  { %320 = vsyncadd [#allocation4], 4294966784 }
  0xf6   :  { %189 = vsyncpa [#allocation3], 1 }
  0xf7   :  { %190 = vsyncpa [#allocation6], 1 }
  0xf8   :  { %191 = vsyncpa [#allocation4], 1 }

</bundles_post_ra>
